<compile_context>
chip_gen: v5e
topology: v5e:2x2
jax: 0.10.0
libtpu: 0.0.40
codegen_flags: <defaults>
</compile_context>

<pallas_src>
import jax
import jax.numpy as jnp
from jax import lax
from jax.experimental import pallas as pl
from jax.experimental.pallas import tpu as pltpu

EPS = 1e-5          # nn.InstanceNorm1d default eps
LEAKY_SLOPE = 0.2   # nn.LeakyReLU(0.2)


def _upsample_block_kernel(x_ref, gb_ref, w_ref, b_ref, out_ref):
    # x_ref:  (1, C_in, L) f32        gb_ref: (1, 2*C_in, 1) f32  (gamma ++ beta)
    # w_ref:  (2*C_out, 3*C_in) bf16  fused conv taps (built once in the wrapper)
    # b_ref:  (2*C_out, 1) f32
    # out_ref:(1, 2*C_out, L) f32 -- rows [0:C_out] = even phase, [C_out:] = odd phase
    x = x_ref[0]                          # (C_in, L)
    c_in, L = x.shape
    gb = gb_ref[0]                        # (2*C_in, 1)
    gamma = gb[:c_in]                     # (C_in, 1)
    beta = gb[c_in:]                      # (C_in, 1)

    # ---- AdaInsNorm fused into one scale/shift pass over the tile ----
    # One-pass stats: mean and E[x^2] (two XLU lane reductions), rsqrt on the EUP.
    mean = jnp.mean(x, axis=1, keepdims=True)                                  # (C_in, 1)
    var = jnp.maximum(jnp.mean(x * x, axis=1, keepdims=True) - mean * mean, 0.0)
    scale = gamma * lax.rsqrt(var + EPS)                                       # (C_in, 1)
    shift = beta - mean * scale                                                # (C_in, 1)
    xn = scale * x + shift                                                     # (C_in, L)

    # Shifted copies for the conv halo (zero 'same' padding of the upsampled, normalized
    # signal at the sequence ends). pltpu.roll runs on the XLU slot.
    idx = lax.broadcasted_iota(jnp.int32, xn.shape, 1)
    xl = jnp.where(idx == 0, 0.0, pltpu.roll(xn, shift=1, axis=1))            # xn[:, j-1]
    xr = jnp.where(idx == L - 1, 0.0, pltpu.roll(xn, shift=L - 1, axis=1))    # xn[:, j+1]

    # Stack along K and run ONE bf16 MXU matmul covering both output phases (f32 accumulate).
    rhs = jnp.concatenate([xl, xn, xr], axis=0).astype(jnp.bfloat16)          # (3*C_in, L)
    y = jnp.dot(w_ref[...], rhs, preferred_element_type=jnp.float32) + b_ref[...]

    # LeakyReLU(0.2): max(y, 0.2*y) — valid for slope in (0,1), saves the compare/select.
    y = jnp.maximum(y, LEAKY_SLOPE * y)
    out_ref[0] = y.astype(out_ref.dtype)


def upsample_block_forward(x, timestep, params):
    """x: (B, C_in, L) f32, timestep: (B,) int32 class ids. Returns (B, C_out, 2L) f32."""
    B, C_in, L = x.shape
    emb = params["embed"]              # (num_classes, 2*C_in)
    w = params["conv_w"]               # (C_out, C_in, 3)
    b = params["conv_b"]               # (C_out,)
    C_out = w.shape[0]

    # Glue: embedding lookup -> per-sample (gamma ++ beta) as one column input.
    gb = emb[timestep].astype(jnp.float32).reshape(B, 2 * C_in, 1)

    # Glue (done once, not per grid step): fold upsample+conv into the fused block matrix.
    w = w.astype(jnp.float32)
    w0, w1, w2 = w[:, :, 0], w[:, :, 1], w[:, :, 2]
    zeros = jnp.zeros_like(w0)
    w_even = jnp.concatenate([w0, w1 + w2, zeros], axis=1)   # (C_out, 3*C_in)
    w_odd = jnp.concatenate([zeros, w0 + w1, w2], axis=1)    # (C_out, 3*C_in)
    w_blk = jnp.concatenate([w_even, w_odd], axis=0).astype(jnp.bfloat16)  # (2*C_out, 3*C_in)
    b2 = jnp.concatenate([b, b]).reshape(2 * C_out, 1).astype(jnp.float32)

    phases = pl.pallas_call(
        _upsample_block_kernel,
        out_shape=jax.ShapeDtypeStruct((B, 2 * C_out, L), jnp.float32),
        grid_spec=pltpu.PrefetchScalarGridSpec(
            num_scalar_prefetch=0,
            grid=(B,),
            in_specs=[
                pl.BlockSpec((1, C_in, L), lambda bi: (bi, 0, 0)),        # x
                pl.BlockSpec((1, 2 * C_in, 1), lambda bi: (bi, 0, 0)),    # gamma ++ beta
                pl.BlockSpec((2 * C_out, 3 * C_in), lambda bi: (0, 0)),   # fused conv taps
                pl.BlockSpec((2 * C_out, 1), lambda bi: (0, 0)),          # bias (even;odd)
            ],
            out_specs=pl.BlockSpec((1, 2 * C_out, L), lambda bi: (bi, 0, 0)),
        ),
        compiler_params=pltpu.CompilerParams(
            dimension_semantics=("parallel",),
            vmem_limit_bytes=32 * 1024 * 1024,
        ),
    )(x.astype(jnp.float32), gb, w_blk, b2)

    # Glue: interleave even/odd phases -> (B, C_out, 2L). Single fused XLA transpose-copy.
    out = jnp.transpose(phases.reshape(B, 2, C_out, L), (0, 2, 3, 1)).reshape(B, C_out, 2 * L)
    return out


def _reference_forward(x, timestep, params):
    """Pure-JAX f32 reference mirroring the PyTorch module."""
    B, C_in, L = x.shape
    emb = params["embed"]
    w = params["conv_w"]
    b = params["conv_b"]
    gb = emb[timestep]
    gamma = gb[:, :C_in][:, :, None]
    beta = gb[:, C_in:][:, :, None]
    mean = jnp.mean(x, axis=2, keepdims=True)
    var = jnp.mean((x - mean) ** 2, axis=2, keepdims=True)
    xn = (x - mean) / jnp.sqrt(var + EPS)
    xn = gamma * xn + beta
    up = jnp.repeat(xn, 2, axis=2)                               # nearest, scale_factor=2
    y = lax.conv_general_dilated(up, w, window_strides=(1,),
                                 padding=[(1, 1)],
                                 dimension_numbers=("NCH", "OIH", "NCH"))
    y = y + b[None, :, None]
    return jnp.where(y > 0, y, LEAKY_SLOPE * y)


def init_params(key, in_ch, out_ch, num_classes, kernel=3):
    k1, k2, k3, k4 = jax.random.split(key, 4)
    # AdaInsNorm embedding: gamma part ~ N(1, 0.02), beta part = 0 (typical AdaIN init).
    embed = jnp.concatenate(
        [1.0 + 0.02 * jax.random.normal(k1, (num_classes, in_ch)),
         jnp.zeros((num_classes, in_ch))], axis=1).astype(jnp.float32)
    fan_in = in_ch * kernel
    bound = 1.0 / jnp.sqrt(fan_in)
    conv_w = jax.random.uniform(k2, (out_ch, in_ch, kernel), jnp.float32, -bound, bound)
    conv_b = jax.random.uniform(k3, (out_ch,), jnp.float32, -bound, bound)
    return {"embed": embed, "conv_w": conv_w, "conv_b": conv_b}, k4


if __name__ == "__main__":
    B, C_in, C_out, L, num_classes = 2, 8, 8, 16, 10

    key = jax.random.PRNGKey(0)
    params, key = init_params(key, C_in, C_out, num_classes)
    kx, kt = jax.random.split(key)
    x = jax.random.normal(kx, (B, C_in, L), jnp.float32)
    timestep = jax.random.randint(kt, (B,), 0, num_classes, jnp.int32)

    out = jax.block_until_ready(upsample_block_forward(x, timestep, params))
    ref = jax.block_until_ready(_reference_forward(x, timestep, params))

    assert out.shape == (B, C_out, 2 * L), out.shape
    # bf16 MXU operands with f32 accumulation -> loosen tolerance vs the f32 reference.
    assert jnp.allclose(out, ref, atol=5e-2, rtol=5e-2), float(jnp.max(jnp.abs(out - ref)))
    print("KERNEL_OK")
</pallas_src>

<mosaic_0001>
module attributes {stable_mosaic.version = 11 : i64} {
  func.func @_upsample_block_kernel(%arg0: i32, %arg1: memref<1x8x16xf32, #tpu.memory_space<vmem>>, %arg2: memref<1x16x1xf32, #tpu.memory_space<vmem>>, %arg3: memref<16x24xbf16, #tpu.memory_space<vmem>>, %arg4: memref<16x1xf32, #tpu.memory_space<vmem>>, %arg5: memref<1x16x16xf32, #tpu.memory_space<vmem>>) attributes {dimension_semantics = [#tpu.dimension_semantics<parallel>], iteration_bounds = array<i64: 2>, scalar_prefetch = 0 : i64, scratch_operands = 0 : i64, tpu.core_type = #tpu.core_type<tc>, window_params = [{transform_indices = @transform_0, window_bounds = array<i64: 1, 8, 16>}, {transform_indices = @transform_1, window_bounds = array<i64: 1, 16, 1>}, {pipeline_mode = #tpu.pipeline_mode<synchronous>, transform_indices = @transform_2, window_bounds = array<i64: 16, 24>}, {pipeline_mode = #tpu.pipeline_mode<synchronous>, transform_indices = @transform_3, window_bounds = array<i64: 16, 1>}, {transform_indices = @transform_4, window_bounds = array<i64: 1, 16, 16>}]} {
    %c0 = arith.constant 0 : index
    %c0_0 = arith.constant 0 : index
    %c0_1 = arith.constant 0 : index
    %0 = vector.load %arg1[%c0, %c0_0, %c0_1] : memref<1x8x16xf32, #tpu.memory_space<vmem>>, vector<1x8x16xf32>
    %1 = vector.shape_cast %0 : vector<1x8x16xf32> to vector<8x16xf32>
    %c0_2 = arith.constant 0 : index
    %c0_3 = arith.constant 0 : index
    %c0_4 = arith.constant 0 : index
    %2 = vector.load %arg2[%c0_2, %c0_3, %c0_4] : memref<1x16x1xf32, #tpu.memory_space<vmem>>, vector<1x16x1xf32>
    %3 = vector.shape_cast %2 : vector<1x16x1xf32> to vector<16x1xf32>
    %4 = vector.extract_strided_slice %3 {offsets = [0, 0], sizes = [8, 1], strides = [1, 1]} : vector<16x1xf32> to vector<8x1xf32>
    %5 = vector.extract_strided_slice %3 {offsets = [8, 0], sizes = [8, 1], strides = [1, 1]} : vector<16x1xf32> to vector<8x1xf32>
    %cst = arith.constant dense<0.000000e+00> : vector<8xf32>
    %6 = vector.multi_reduction <add>, %1, %cst [1] : vector<8x16xf32> to vector<8xf32>
    %7 = vector.shape_cast %6 : vector<8xf32> to vector<8x1xf32>
    %cst_5 = arith.constant 1.600000e+01 : f32
    %8 = vector.broadcast %cst_5 : f32 to vector<8x1xf32>
    %9 = arith.divf %7, %8 : vector<8x1xf32>
    %10 = arith.mulf %1, %1 : vector<8x16xf32>
    %cst_6 = arith.constant dense<0.000000e+00> : vector<8xf32>
    %11 = vector.multi_reduction <add>, %10, %cst_6 [1] : vector<8x16xf32> to vector<8xf32>
    %12 = vector.shape_cast %11 : vector<8xf32> to vector<8x1xf32>
    %cst_7 = arith.constant 1.600000e+01 : f32
    %13 = vector.broadcast %cst_7 : f32 to vector<8x1xf32>
    %14 = arith.divf %12, %13 : vector<8x1xf32>
    %15 = arith.mulf %9, %9 : vector<8x1xf32>
    %16 = arith.subf %14, %15 : vector<8x1xf32>
    %cst_8 = arith.constant 0.000000e+00 : f32
    %17 = vector.broadcast %cst_8 : f32 to vector<8x1xf32>
    %18 = arith.maximumf %16, %17 : vector<8x1xf32>
    %cst_9 = arith.constant 9.99999974E-6 : f32
    %19 = vector.broadcast %cst_9 : f32 to vector<8x1xf32>
    %20 = arith.addf %18, %19 : vector<8x1xf32>
    %21 = math.rsqrt %20 : vector<8x1xf32>
    %22 = arith.mulf %4, %21 : vector<8x1xf32>
    %23 = arith.mulf %9, %22 : vector<8x1xf32>
    %24 = arith.subf %5, %23 : vector<8x1xf32>
    %25 = vector.broadcast %22 : vector<8x1xf32> to vector<8x16xf32>
    %26 = arith.mulf %25, %1 : vector<8x16xf32>
    %27 = vector.broadcast %24 : vector<8x1xf32> to vector<8x16xf32>
    %28 = arith.addf %26, %27 : vector<8x16xf32>
    %29 = tpu.iota {dimensions = array<i32: 1>} : vector<8x16xi32>
    %c0_i32 = arith.constant 0 : i32
    %30 = vector.broadcast %c0_i32 : i32 to vector<8x16xi32>
    %31 = arith.cmpi eq, %29, %30 : vector<8x16xi32>
    %c1_i32 = arith.constant 1 : i32
    %32 = tpu.dynamic_rotate %28 by %c1_i32 dim 1 : vector<8x16xf32>, i32 -> vector<8x16xf32>
    %cst_10 = arith.constant 0.000000e+00 : f32
    %33 = vector.broadcast %cst_10 : f32 to vector<8x16xf32>
    %34 = arith.select %31, %33, %32 : vector<8x16xi1>, vector<8x16xf32>
    %c15_i32 = arith.constant 15 : i32
    %35 = vector.broadcast %c15_i32 : i32 to vector<8x16xi32>
    %36 = arith.cmpi eq, %29, %35 : vector<8x16xi32>
    %c15_i32_11 = arith.constant 15 : i32
    %37 = tpu.dynamic_rotate %28 by %c15_i32_11 dim 1 : vector<8x16xf32>, i32 -> vector<8x16xf32>
    %cst_12 = arith.constant 0.000000e+00 : f32
    %38 = vector.broadcast %cst_12 : f32 to vector<8x16xf32>
    %39 = arith.select %36, %38, %37 : vector<8x16xi1>, vector<8x16xf32>
    %40 = tpu.concatenate %34, %28, %39 in 0 : vector<8x16xf32>, vector<8x16xf32>, vector<8x16xf32> -> vector<24x16xf32>
    %41 = arith.truncf %40 : vector<24x16xf32> to vector<24x16xbf16>
    %c0_13 = arith.constant 0 : index
    %c0_14 = arith.constant 0 : index
    %42 = vector.load %arg3[%c0_13, %c0_14] : memref<16x24xbf16, #tpu.memory_space<vmem>>, vector<16x24xbf16>
    %cst_15 = arith.constant dense<0.000000e+00> : vector<16x16xf32>
    %43 = tpu.matmul %42, %41, %cst_15 {dimension_numbers = #tpu.dot_dimension_numbers<[1], [0], [0], [1], [0, 0, 1, 1], [], []>} : vector<16x24xbf16>, vector<24x16xbf16>, vector<16x16xf32> -> vector<16x16xf32>
    %c0_16 = arith.constant 0 : index
    %c0_17 = arith.constant 0 : index
    %44 = vector.load %arg4[%c0_16, %c0_17] : memref<16x1xf32, #tpu.memory_space<vmem>>, vector<16x1xf32>
    %45 = vector.broadcast %44 : vector<16x1xf32> to vector<16x16xf32>
    %46 = arith.addf %43, %45 : vector<16x16xf32>
    %cst_18 = arith.constant 2.000000e-01 : f32
    %47 = vector.broadcast %cst_18 : f32 to vector<16x16xf32>
    %48 = arith.mulf %47, %46 : vector<16x16xf32>
    %49 = arith.maximumf %46, %48 : vector<16x16xf32>
    %c0_19 = arith.constant 0 : index
    %c0_20 = arith.constant 0 : index
    %c0_21 = arith.constant 0 : index
    %50 = vector.load %arg5[%c0_19, %c0_20, %c0_21] : memref<1x16x16xf32, #tpu.memory_space<vmem>>, vector<1x16x16xf32>
    %51 = vector.shape_cast %50 : vector<1x16x16xf32> to vector<16x16xf32>
    %52 = vector.shape_cast %49 : vector<16x16xf32> to vector<1x16x16xf32>
    tpu.vector_store %arg5[%c0_19, %c0_20, %c0_21], %52 {strides = array<i32>} : memref<1x16x16xf32, #tpu.memory_space<vmem>>, vector<1x16x16xf32>,
    return
  }
  func.func @transform_0(%arg0: i32) -> (i32, i32, i32) {
    %c0_i32 = arith.constant 0 : i32
    %c0_i32_0 = arith.constant 0 : i32
    %c0_i32_1 = arith.constant 0 : i32
    return %arg0, %c0_i32, %c0_i32_0 : i32, i32, i32
  }
  func.func @transform_1(%arg0: i32) -> (i32, i32, i32) {
    %c0_i32 = arith.constant 0 : i32
    %c0_i32_0 = arith.constant 0 : i32
    %c0_i32_1 = arith.constant 0 : i32
    return %arg0, %c0_i32, %c0_i32_0 : i32, i32, i32
  }
  func.func @transform_2(%arg0: i32) -> (i32, i32) {
    %c0_i32 = arith.constant 0 : i32
    %c0_i32_0 = arith.constant 0 : i32
    %c0_i32_1 = arith.constant 0 : i32
    return %c0_i32, %c0_i32_0 : i32, i32
  }
  func.func @transform_3(%arg0: i32) -> (i32, i32) {
    %c0_i32 = arith.constant 0 : i32
    %c0_i32_0 = arith.constant 0 : i32
    %c0_i32_1 = arith.constant 0 : i32
    return %c0_i32, %c0_i32_0 : i32, i32
  }
  func.func @transform_4(%arg0: i32) -> (i32, i32, i32) {
    %c0_i32 = arith.constant 0 : i32
    %c0_i32_0 = arith.constant 0 : i32
    %c0_i32_1 = arith.constant 0 : i32
    return %arg0, %c0_i32, %c0_i32_0 : i32, i32, i32
  }
}

</mosaic_0001>

<bundles_post_ra>
// kernel: tpu_custom_call.1
= control target key start
LH: loop header
LB: loop body
LE: loop exit
PB: predicated region body
PF: predicated region fallthrough
CT: control target
= control target key end

     0   :  { %9 = vsyncpa [#allocation3], 0  ;;  %s704_s0 = inlined_call_operand.vmem [shape: f32[2,8,16], index: 0, kind: input, shape index: {}]   ;;  %s705_s1 = inlined_call_operand.vmem [shape: f32[2,16,1], index: 1, kind: input, shape index: {}]   ;;  %s706_s2 = inlined_call_operand.vmem [shape: bf16[16,24], index: 2, kind: input, shape index: {}]   ;;  %s707_s3 = inlined_call_operand.vmem [shape: f32[16,1], index: 3, kind: input, shape index: {}]   ;;  %s708_s4 = inlined_call_operand.hbm [shape: f32[2,16,16], index: 4, kind: output, shape index: {}]  }
   0x1   :  { %11 = vsyncpa [#allocation3 + $0x1], 0  ;;  %s599_s15 = smov 0   ;;  %s601_s16 = smov 0  }
   0x2   :  { %s603_s17 = smov 0   ;;  %s605_s18 = smov 0  }
   0x3 LB: > { %s620_s19 = sadd.s32 4294967295, %s564_s18   ;;  %s422_s20 = sadd.s32 4294967294, %s564_s18   ;;  %s564_s18 = sphi %s605_s18, %s714_s18   ;;  %s560_s17 = sphi %s603_s17, %s713_s17   ;;  %s556_s16 = sphi %s601_s16, %s712_s16   ;;  %s552_s15 = sphi %s599_s15, %s711_s15  }
   0x4   : > { %s624_s21 = sadd.s32 1, %s564_s18   ;;  %s118_s22 = sadd.s32 1, %s560_s17 }
   0x5   : > { %s115_s23 = ssub.s32 %s564_s18, %s624_s21  ;;  %p128_p0 = scmp.ne.s32.totalorder %s560_s17, %s556_s16 }
   0x6   : > { %p116_p1 = scmp.eq.s32.totalorder %s115_s23, 0  ;;  %p129_p2 = scmp.eq.s32.totalorder %s620_s19, 1 }
   0x7   : > { %p134_p3 = scmp.ne.s32.totalorder %s556_s16, %s552_s15  ;;  %p135_p4 = scmp.eq.s32.totalorder %s422_s20, 1 }
   0x8   : > { %s635_s24 = scalar_select %p116_p1, %s560_s17, %s118_s22  }
   0x9   : > { %p637_p5 = por %p129_p2, %p128_p0  ;;  %p641_p6 = por %p135_p4, %p134_p3 }
   0xa   : > { %p425_p7 = scmp.ge.s32.totalorder %s564_s18, 1  ;;  %p174_p8 = scmp.lt.s32.totalorder %s564_s18, 3 }
   0xc   : > { %p175_p9 = pnand %p425_p7, %p174_p8 }
   0xd   : > { %p204_p10 = scmp.lt.s32.totalorder (!%p175_p9), %s620_s19, 1  ;;  %s568_s10 = smov (!%p175_p9), 16  }
   0xe   : > { %178 = sbr.rel (%p175_p9) target bundleno = 756 (0x2f4), region = 36  ;;  %s569_s11 = smov (!%p175_p9), 113  }
   0xf   : > { %s570_s12 = smov (!%p175_p9), 127   ;;  %s446_s30 = sshll.u32 (!%p175_p9), %s620_s19, 4 }
  0x10   : > { %s344_s7 = scalar_lea.hbm (!%p175_p9), %s708_s4, %s446_s30  ;;  %s522_s20 = scalar_lea.hbm (!%p175_p9), %s708_s4, 32 }
  0x13   : > { %s649_s27 = scalar_select %p204_p10, %s620_s19, 1  ;;  %vm217_vm0 = vcmask 130048   ;;  %v566_v4 = vmov 16.0   ;;  %v567_v8 = vmov 0   ;;  %vm266_vm5 = vcmask 1047680   ;;  %v288_v40 = vld [vmem:[%s707_s3 + $0x8] sm:$0xff] }
  0x14   : > { %498 = vrcp.f32 %v566_v4  ;;  %495 = vset.pattern.permute.xlu1 %v567_v8  ;;  %496 = vset.pattern.permute.xlu2 %v567_v8  ;;  %v287_v41 = vld [vmem:[%s707_s3] sm:$0xff]  ;;  %v263_v42 = vlaneseq  ;;  %vm308_vm7 = vcmask 1043456   ;;  %vm571_vm9 = vmmov 1  }
  0x15   : > { %s427_s28 = sshll.u32 %s649_s27, 3  ;;  %497 = vset.pattern.permute.xlu0 %v567_v8  ;;  %s444_s6 = sshll.u32 %s649_s27, 4  ;;  %v445_v50 = vld [vmem:[%s706_s2] sm:$0xff]  ;;  %vm304_vm11 = vcmask 195584  }
  0x16   : > { %s207_s5 = scalar_lea.vmem %s704_s0, %s427_s28  ;;  %s212_s9 = scalar_lea.vmem %s705_s1, %s444_s6  ;;  %v264_v43 = vand.u32 127, %v263_v42 }
  0x17   : > { %v214_v0 = vld [vmem:[%s207_s5] sm:$0xff]  ;;  %v216_v30 = vld [vmem:[%s212_s9 + $0x8] sm:$0xff]  ;;  %s201_s28 = sand.u32 1, %s556_s16  }
  0x18   : > { %v218_v1 = vsel %vm217_vm0, %v214_v0, 0.0  ;;  %v229_v2 = vmul.f32 %v214_v0, %v214_v0  ;;  %v215_v25 = vld [vmem:[%s212_s9] sm:$0xff]  ;;  %vm278_vm6 = vcmp.eq.s32.totalorder %v264_v43, 15  ;;  %vm447_vm8 = vcmp.ne.s32.totalorder %v264_v43, 0  ;;  %s426_s29 = sshll.u32 %s201_s28, 4  ;;  %s333_s19 = scalar_lea.sflag [#allocation3], %s201_s28 }
  0x19   : > { %219 = vadd.xlane.f32.xlu0 %v218_v1  ;;  %vm435_vm10 = vmpackc.low %vm571_vm9, %vm447_vm8  ;;  %s203_s8 = scalar_lea.vmem [#allocation2], %s426_s29 }
  0x1a   : > { %v230_v3 = vsel %vm217_vm0, %v229_v2, 0.0  ;;  %v499_v5 = vpop.eup %498  ;;  %s345_s9 = sshll.u32 %s203_s8, 4  ;;  %s346_s9 = int_to_ptr.vmem [resolvable:$true] %s345_s9 }
  0x1b   : > { %v222_v6 = vmul.f32 16.0, %v499_v5  ;;  %vm226_vm1 = vweird.f32 %v499_v5 }
  0x1d   : > { %v223_v7 = vsub.f32 1.0, %v222_v6 }
  0x1f   : > { %v224_v9 = vmul.f32 %v499_v5, %v223_v7 }
  0x21   : > { %231 = vadd.xlane.f32.xlu0 %v230_v3  ;;  %v225_v10 = vadd.f32 %v499_v5, %v224_v9 }
  0x23   : > { %v227_v12 = vsel %vm226_vm1, %v499_v5, %v225_v10 }
  0x8c   : > { %v220_v11 = vpop.xlane.xlu0 %219 }
  0x8d   : > { %v228_v13 = vmul.f32 %v227_v12, %v220_v11 }
  0x8f   : > { %v234_v15 = vmul.f32 %v228_v13, %v228_v13 }
  0x94   : > { %v232_v14 = vpop.xlane.xlu0 %231 }
  0x95   : > { %v233_v16 = vmul.f32 %v232_v14, %v227_v12 }
  0x97   : > { %v235_v17 = vsub.f32 %v233_v16, %v234_v15 }
  0x99   : > { %v236_v18 = vmax.f32 %v235_v17, 0.0 }
  0x9b   : > { %v237_v19 = vadd.f32 1e-05, %v236_v18 }
  0x9d   : > { %500 = vrsqrt.f32 %v237_v19  ;;  %vm244_vm3 = vweird.f32 %v237_v19 }
  0xa3   : > { %v501_v20 = vpop.eup %500 }
  0xa4   : > { %v239_v21 = vmul.f32 %v501_v20, %v237_v19  ;;  %vm245_vm2 = vweird.f32 %v501_v20 }
  0xa5   : > { %vm246_vm4 = vmor %vm244_vm3, %vm245_vm2 }
  0xa6   : > { %v240_v22 = vmul.f32 %v501_v20, %v239_v21 }
  0xa8   : > { %v241_v23 = vmul.f32 0.5, %v240_v22 }
  0xaa   : > { %v242_v24 = vsub.f32 1.5, %v241_v23 }
  0xac   : > { %v243_v26 = vmul.f32 %v501_v20, %v242_v24 }
  0xae   : > { %v247_v27 = vsel %vm246_vm4, %v501_v20, %v243_v26 }
  0xaf   : > { %v248_v28 = vmul.f32 %v247_v27, %v215_v25 }
  0xb1   : > { %253 = vperm.xlu1 %495, %v248_v28   ;;  %v249_v29 = vmul.f32 %v248_v28, %v228_v13 }
  0xb3   : > { %v250_v31 = vsub.f32 %v216_v30, %v249_v29 }
  0xb9   : > { %259 = vperm.xlu1 %495, %v250_v31  }
 0x123   : > { %v254_v32 = vpop.permute.xlu1 %253 }
 0x124   : > { %v256_v33 = vmul.f32 %v254_v32, %v214_v0 }
 0x12b   : > { %v260_v34 = vpop.permute.xlu1 %259 }
 0x12c   : > { %v262_v35 = vadd.f32 %v260_v34, %v256_v33 }
 0x12e   : > { %267 = vrot.lane.b32.xlu2 %v262_v35, %s568_s10 }
 0x188   : > { %v268_v36 = vpop.permute.xlu2 %267 }
 0x189   : > { %v269_v37 = vsel %vm266_vm5, %v268_v36, %v262_v35 }
 0x18a   : > { %270 = vrot.lane.b32.xlu2 %v269_v37, %s568_s10  ;;  %s347_s10 = sshll.u32 %s344_s7, 4  ;;  %s348_s10 = int_to_ptr.hbm [resolvable:$true] %s347_s10 }
 0x192   : > { %291 = vperm.xlu2 %496, %v287_v41  }
 0x1e4   : > { %v271_v38 = vpop.permute.xlu2 %270 }
 0x1e5   : > { %v272_v39 = vsel %vm266_vm5, %v271_v38, %v262_v35 }
 0x1e6   : > { %274 = vrot.lane.b32.xlu1 %v272_v39, %s569_s11  ;;  %279 = vrot.lane.b32.xlu0 %v272_v39, %s570_s12  ;;  %s516_s11 = sshra.s32 %s348_s10, 4  ;;  %s517_s11 = int_to_ptr.hbm [resolvable:$true] %s516_s11 }
 0x1e7   : > { %s518_s12 = scalar_lea.hbm %s517_s11, 16  ;;  %p523_p0 = scmp.lt.s32.totalorder %s517_s11, %s708_s4 }
 0x1e8   : > { %p519_p11 = scmp.ne.s32.totalorder %s517_s11, %s518_s12  ;;  %p524_p1 = scmp.lt.s32.totalorder %s522_s20, %s518_s12 }
 0x1ea   : > { %p520_p12 = pnand %p519_p11, %p637_p5  ;;  %p525_p2 = por %p524_p1, %p523_p0 }
 0x1ec   : > { %v292_v51 = vpop.permute.xlu2 %291  ;;  %p521_p13 = pneg %p520_p12 }
 0x1ee   : > { %296 = vperm.xlu1 %495, %v288_v40   ;;  %p526_p3 = pnand %p525_p2, %p521_p13 }
 0x258   : > { %v280_v44 = vpop.permute.xlu0 %279  ;;  %v275_v47 = vpop.permute.xlu1 %274 }
 0x259   : > { %v282_v45 = vsel %vm278_vm6, 0.0, %v280_v44  ;;  %v436_v49 = vpack.c.bf16 %v262_v35, %v275_v47 }
 0x25a   : > { %v284_v46 = vpack.c.bf16 %v282_v45, %v282_v45 }
 0x25c   : > { %v310_v48 = vsel %vm308_vm7, %v284_v46, 0 }
 0x25d   : > { %318 = vmatpush.bf16.msra.mxu0 %v310_v48 }
 0x260   : > { %v297_v56 = vpop.permute.xlu1 %296 }
 0x261   : > { %437 = vmatpush.bf16.msk.msra.mxu0 %vm435_vm10, %v436_v49 }
 0x264   : > { %438 = vmatmul.msk.bf16.vlgmr.msra.gmra.mxu0 %vm304_vm11, %v445_v50 }
 0x2e1   : > { %v321_v52 = vpop.f32.mrf.mxu0 }
 0x2e2   : > { %v322_v53 = vadd.f32 %v321_v52, %v292_v51 }
 0x2e4   : > { %v326_v54 = vmul.f32 0.2, %v322_v53 }
 0x2e6   : > { %v328_v55 = vmax.f32 %v322_v53, %v326_v54 }
 0x2e8   : > { %330 = vst.msk [vmem:[%s203_s8] sm:$0xff] %vm217_vm0, %v328_v55 }
 0x2e9   : > { %v323_v57 = vpop.f32.mrf.mxu0 }
 0x2ea   : > { %v324_v58 = vadd.f32 %v323_v57, %v297_v56 }
 0x2ec   : > { %v327_v59 = vmul.f32 0.2, %v324_v58 }
 0x2ee   : > { %v329_v60 = vmax.f32 %v324_v58, %v327_v59 }
 0x2f0   : > { %331 = vst.msk [vmem:[%s203_s8 + $0x8] sm:$0xff] %vm217_vm0, %v329_v60 }
 0x2f1   : > { %529 = shalt.err (!%p526_p3)
}
 0x2f2   : > { %s572_s27 = smov 128   ;;  %s573_s28 = smov 8  }
 0x2f3   : > { %448 = dma.vmem_to_hbm [thread:$0]  (%p637_p5), %s346_s9, 256, %s348_s10, %s333_s19, %s572_s27, %s572_s27, %s573_s28  }
 0x2f4 PF: > { %p454_p4 = scmp.ge.s32.totalorder %s564_s18, 2  ;;  %s362_s29 = sand.u32 1, %s552_s15  }
 0x2f5   : > { %s363_s30 = scalar_lea.sflag [#allocation3], %s362_s29 }
 0x2f6   : > { %p451_p7 = pnand %p454_p4, %p641_p6 }
 0x2f8   : > { %p452_p8 = pneg %p451_p7 }
 0x2fa   : > { %547 = dma.done.wait (%p452_p8), %s363_s30, 256  }
 0x2fb   : > { %549 = vsyncadd (%p452_p8), %s363_s30, 4294967040  ;;  %p14_p9 = scmp.ge.s32.totalorder %s624_s21, 4   ;;  %s711_s15 = smov %s556_s16 }
 0x2fc   : > { %s712_s16 = smov %s560_s17  ;;  %s713_s17 = smov %s635_s24 }
 0x2fd   : > { %s714_s18 = smov %s624_s21  ;;  %16 = sbr.rel (!%p14_p9) target bundleno = 3 (0x3), region = 74 }
 0x302   :  { %369 = vsyncpa [#allocation3], 1 }
 0x303   :  { %371 = vsyncpa [#allocation3 + $0x1], 1 }

</bundles_post_ra>
